<compile_context>
chip_gen: v6e
topology: v6e:2x2x1
jax: 0.10.0
libtpu: 0.0.40
codegen_flags: <defaults>
</compile_context>

<pallas_src>
import functools

import jax
import jax.numpy as jnp
from jax.experimental import pallas as pl
from jax.experimental.pallas import tpu as pltpu

C0 = 0.28209479177387814
C1 = 0.4886025119029199
C2 = [1.0925484305920792, -1.0925484305920792, 0.31539156525252005,
      -1.0925484305920792, 0.5462742152960396]
C3 = [-0.5900435899266435, 2.890611442640554, -0.4570457994644658,
      0.3731763325901154, -0.4570457994644658, 1.445305721320277,
      -0.5900435899266435]
C4 = [2.5033429417967046, -1.7701307697799304, 0.9461746957575601,
      -0.6690465435572892, 0.10578554691520431, -0.6690465435572892,
      0.47308734787878004, -1.7701307697799304, 0.6258357354491761]

_LANE = 128
_SUB = 8


def _sh_kernel(in_ref, out_ref, *, degree: int):
    """in_ref: (3, tile_rows, 128) ; out_ref: (degree**2, tile_rows, 128).

    Polynomial math in f32 (matches the f32 PyTorch reference even for bf16
    inputs); cast to the output dtype only at each full-slab store.
    """
    out_dt = out_ref.dtype
    x = in_ref[0].astype(jnp.float32)           # (tile_rows, 128) full slabs
    y = in_ref[1].astype(jnp.float32)
    z = in_ref[2].astype(jnp.float32)

    def st(k, v):
        out_ref[k] = v.astype(out_dt)

    out_ref[0] = jnp.full(x.shape, C0, dtype=out_dt)
    if degree > 1:
        st(1, (-C1) * y)
        st(2, C1 * z)
        st(3, (-C1) * x)
        if degree > 2:
            xx = x * x
            yy = y * y
            zz = z * z
            xy = x * y
            yz = y * z
            xz = x * z
            xx_m_yy = xx - yy
            st(4, C2[0] * xy)
            st(5, C2[1] * yz)
            st(6, C2[2] * (2.0 * zz - xx - yy))
            st(7, C2[3] * xz)
            st(8, C2[4] * xx_m_yy)
            if degree > 3:
                three_xx = 3.0 * xx
                three_yy = 3.0 * yy
                t_3xx_m_yy = three_xx - yy
                t_xx_m_3yy = xx - three_yy
                four_zz_m_r = 4.0 * zz - xx - yy
                st(9, C3[0] * y * t_3xx_m_yy)
                st(10, C3[1] * xy * z)
                st(11, C3[2] * y * four_zz_m_r)
                st(12, C3[3] * z * (2.0 * zz - three_xx - three_yy))
                st(13, C3[4] * x * four_zz_m_r)
                st(14, C3[5] * z * xx_m_yy)
                st(15, C3[6] * x * t_xx_m_3yy)
                if degree > 4:
                    seven_zz_m1 = 7.0 * zz - 1.0
                    seven_zz_m3 = 7.0 * zz - 3.0
                    st(16, C4[0] * xy * xx_m_yy)
                    st(17, C4[1] * yz * t_3xx_m_yy)
                    st(18, C4[2] * xy * seven_zz_m1)
                    st(19, C4[3] * yz * seven_zz_m3)
                    st(20, C4[4] * (zz * (35.0 * zz - 30.0) + 3.0))
                    st(21, C4[5] * xz * seven_zz_m3)
                    st(22, C4[6] * xx_m_yy * seven_zz_m1)
                    st(23, C4[7] * xz * t_xx_m_3yy)
                    st(24, C4[8] * (xx * t_xx_m_3yy - yy * t_3xx_m_yy))


def _vmem_capacity_bytes() -> int:
    try:
        return int(pltpu.get_tpu_info().vmem_capacity_bytes)
    except Exception:
        return 128 * 1024 * 1024        # v5e/v6e physical VMEM fallback


def _pick_tile_rows(n_rows: int, out_dim: int, in_itemsize: int,
                    out_itemsize: int, tile_rows):
    """Pick sublane-row tile + report its double-buffered VMEM footprint."""
    per_row = 2 * _LANE * (3 * in_itemsize + out_dim * out_itemsize)  # 2 bufs
    if tile_rows is None:
        budget = _vmem_capacity_bytes() // 2   # headroom for compiler scratch
        tile_rows = min(budget // per_row, 2048)
    tile_rows = max(_SUB, (int(tile_rows) // _SUB) * _SUB)
    tile_rows = min(tile_rows, n_rows)
    # Target >= 8 grid steps (>= 4 per TensorCore on dual-core v7x) when there
    # is enough work, so each core keeps prefetch/writeback overlap.
    if n_rows >= 8 * _SUB:
        cap = pl.cdiv(pl.cdiv(n_rows, 8), _SUB) * _SUB
        tile_rows = min(tile_rows, max(cap, _SUB))
    return tile_rows, per_row * tile_rows


def _encode_padded(comp: jax.Array, degree: int, out_dtype, tile_rows):
    """comp: (3, n_rows, 128) SoA, padded. Returns (out_dim, n_rows, 128)."""
    out_dim = degree ** 2
    _, n_rows, _ = comp.shape
    n_pad = n_rows * _LANE
    in_itemsize = jnp.dtype(comp.dtype).itemsize
    out_itemsize = jnp.dtype(out_dtype).itemsize

    tile_rows, footprint = _pick_tile_rows(n_rows, out_dim, in_itemsize,
                                           out_itemsize, tile_rows)
    grid = (pl.cdiv(n_rows, tile_rows),)

    vmem_cap = _vmem_capacity_bytes()
    vmem_limit = min(int(vmem_cap * 0.9),
                     max(footprint + (4 << 20), 32 << 20))

    cost = pl.CostEstimate(
        flops=int((3 * out_dim + 10) * n_pad),
        transcendentals=0,
        bytes_accessed=int((3 * in_itemsize + out_dim * out_itemsize) * n_pad),
    )

    return pl.pallas_call(
        functools.partial(_sh_kernel, degree=degree),
        out_shape=jax.ShapeDtypeStruct((out_dim, n_rows, _LANE), out_dtype),
        grid_spec=pltpu.PrefetchScalarGridSpec(
            num_scalar_prefetch=0,
            grid=grid,
            in_specs=[pl.BlockSpec((3, tile_rows, _LANE),
                                   lambda i: (0, i, 0))],
            out_specs=pl.BlockSpec((out_dim, tile_rows, _LANE),
                                   lambda i: (0, i, 0)),
        ),
        compiler_params=pltpu.CompilerParams(
            dimension_semantics=("parallel",),
            vmem_limit_bytes=int(vmem_limit)),
        cost_estimate=cost,
    )(comp)


@functools.partial(jax.jit,
                   static_argnames=("degree", "coeff_major", "out_dtype",
                                    "tile_rows"))
def spherical_encode(inp: jax.Array, degree: int = 4, *,
                     coeff_major: bool = False, out_dtype=None,
                     tile_rows=None) -> jax.Array:
    """Pallas equivalent of SphericalEncoder.forward.

    inp: (..., 3).  Default returns (..., degree**2) (module semantics).
    coeff_major=True returns (degree**2, ...) and skips the output transpose.
    out_dtype: output dtype (e.g. jnp.bfloat16); compute stays f32 in-kernel.
    """
    assert inp.shape[-1] == 3
    assert 1 <= degree <= 5
    out_dim = degree ** 2
    lead_shape = inp.shape[:-1]
    out_dtype = jnp.dtype(out_dtype if out_dtype is not None else inp.dtype)

    flat = inp.reshape(-1, 3)                         # (N, 3)
    n = flat.shape[0]
    n_rows = pl.cdiv(pl.cdiv(max(n, 1), _LANE), _SUB) * _SUB
    n_pad = n_rows * _LANE

    # AoS (N,3) -> SoA (3, n_rows, 128): one fused pad+transpose copy
    # (~24 B/pt).  Callers that already hold SoA directions should use
    # spherical_encode_soa to skip it entirely.
    comp = jnp.pad(flat, ((0, n_pad - n), (0, 0))).T.reshape(3, n_rows, _LANE)

    out = _encode_padded(comp, degree, out_dtype, tile_rows)
    flat_out = out.reshape(out_dim, n_pad)[:, :n]     # coefficient-major
    if coeff_major:
        return flat_out.reshape(out_dim, *lead_shape)
    # (..., out_dim) to match the PyTorch module.  This transpose is a full
    # extra read+write of the output; prefer coeff_major=True (or the SoA
    # entry point) and feed the (out_dim, N) slab straight into the
    # downstream matmul via lax.dot_general contracting dim 0.
    return flat_out.T.reshape(*lead_shape, out_dim)


@functools.partial(jax.jit,
                   static_argnames=("degree", "out_dtype", "tile_rows"))
def spherical_encode_soa(xyz: jax.Array, degree: int = 4, *,
                         out_dtype=None, tile_rows=None) -> jax.Array:
    """SoA fast path: xyz (3, N) -> (degree**2, N), no transposes at all."""
    assert xyz.shape[0] == 3
    assert 1 <= degree <= 5
    out_dim = degree ** 2
    n = xyz.shape[1]
    out_dtype = jnp.dtype(out_dtype if out_dtype is not None else xyz.dtype)
    n_rows = pl.cdiv(pl.cdiv(max(n, 1), _LANE), _SUB) * _SUB
    n_pad = n_rows * _LANE
    comp = jnp.pad(xyz, ((0, 0), (0, n_pad - n))).reshape(3, n_rows, _LANE)
    out = _encode_padded(comp, degree, out_dtype, tile_rows)
    return out.reshape(out_dim, n_pad)[:, :n]


def spherical_encode_ref(inp: jax.Array, degree: int = 4) -> jax.Array:
    """Pure-JAX reference (mirrors the PyTorch forward), f32 compute."""
    f = inp.astype(jnp.float32)
    x, y, z = f[..., 0], f[..., 1], f[..., 2]
    cols = [jnp.full_like(x, C0)]
    if degree > 1:
        cols += [-C1 * y, C1 * z, -C1 * x]
        if degree > 2:
            xx, yy, zz = x * x, y * y, z * z
            xy, yz, xz = x * y, y * z, x * z
            cols += [C2[0] * xy, C2[1] * yz, C2[2] * (2.0 * zz - xx - yy),
                     C2[3] * xz, C2[4] * (xx - yy)]
            if degree > 3:
                cols += [C3[0] * y * (3 * xx - yy), C3[1] * xy * z,
                         C3[2] * y * (4 * zz - xx - yy),
                         C3[3] * z * (2 * zz - 3 * xx - 3 * yy),
                         C3[4] * x * (4 * zz - xx - yy),
                         C3[5] * z * (xx - yy), C3[6] * x * (xx - 3 * yy)]
                if degree > 4:
                    cols += [C4[0] * xy * (xx - yy), C4[1] * yz * (3 * xx - yy),
                             C4[2] * xy * (7 * zz - 1), C4[3] * yz * (7 * zz - 3),
                             C4[4] * (zz * (35 * zz - 30) + 3),
                             C4[5] * xz * (7 * zz - 3),
                             C4[6] * (xx - yy) * (7 * zz - 1),
                             C4[7] * xz * (xx - 3 * yy),
                             C4[8] * (xx * (xx - 3 * yy) - yy * (3 * xx - yy))]
    return jnp.stack(cols, axis=-1)


if __name__ == "__main__":
    key = jax.random.PRNGKey(0)
    k0, k1, k2 = jax.random.split(key, 3)
    degree = 4

    # 1) Small batch of ray directions, default (module-semantics) path.
    dirs = jax.random.normal(k0, (2, 8, 3), dtype=jnp.float32)
    dirs = dirs / jnp.linalg.norm(dirs, axis=-1, keepdims=True)
    out = jax.block_until_ready(spherical_encode(dirs, degree=degree))
    ref = spherical_encode_ref(dirs, degree=degree)
    assert out.shape == (2, 8, degree ** 2), out.shape
    assert jnp.allclose(out, ref, atol=1e-5, rtol=1e-5), \
        float(jnp.max(jnp.abs(out - ref)))

    # 2) 5000 points, small tile override -> multiple grid steps + partial
    #    boundary tile, coefficient-major output (no transpose).
    dirs2 = jax.random.normal(k1, (5000, 3), dtype=jnp.float32)
    dirs2 = dirs2 / jnp.linalg.norm(dirs2, axis=-1, keepdims=True)
    out2 = jax.block_until_ready(
        spherical_encode(dirs2, degree=degree, coeff_major=True, tile_rows=16))
    ref2 = spherical_encode_ref(dirs2, degree=degree)
    assert out2.shape == (degree ** 2, 5000), out2.shape
    assert jnp.allclose(out2, ref2.T, atol=1e-5, rtol=1e-5), \
        float(jnp.max(jnp.abs(out2 - ref2.T)))

    # 3) SoA fast path (3, N) -> (out_dim, N), no input/output copies.
    out2s = jax.block_until_ready(spherical_encode_soa(dirs2.T, degree=degree))
    assert out2s.shape == (degree ** 2, 5000), out2s.shape
    assert jnp.allclose(out2s, ref2.T, atol=1e-5, rtol=1e-5)

    # 4) bf16 in / bf16 out at degree 5: kernel computes in f32, casts at store.
    dirs3 = jax.random.normal(k2, (4, 8, 3), dtype=jnp.float32)
    dirs3 = (dirs3 / jnp.linalg.norm(dirs3, axis=-1, keepdims=True)
             ).astype(jnp.bfloat16)
    out3 = jax.block_until_ready(
        spherical_encode(dirs3, degree=5, out_dtype=jnp.bfloat16))
    ref3 = spherical_encode_ref(dirs3, degree=5)      # f32 ref from bf16 dirs
    assert out3.shape == (4, 8, 25) and out3.dtype == jnp.bfloat16
    assert jnp.allclose(out3.astype(jnp.float32), ref3, atol=5e-2, rtol=5e-2), \
        float(jnp.max(jnp.abs(out3.astype(jnp.float32) - ref3)))

    # TODO(synk): downstream NeRF MLP should consume the coefficient-major
    # (out_dim, N) slab directly (lax.dot_general contracting dim 0) so the
    # default-path output transpose never materializes.
    print("KERNEL_OK")
</pallas_src>

<mosaic_0001>
module attributes {stable_mosaic.version = 11 : i64} {
  func.func @_sh_kernel(%arg0: i32, %arg1: memref<3x8x128xf32, #tpu.memory_space<vmem>>, %arg2: memref<16x8x128xf32, #tpu.memory_space<vmem>>) attributes {dimension_semantics = [#tpu.dimension_semantics<parallel>], iteration_bounds = array<i64: 1>, scalar_prefetch = 0 : i64, scratch_operands = 0 : i64, tpu.core_type = #tpu.core_type<tc>, window_params = [{transform_indices = @transform_0, window_bounds = array<i64: 3, 8, 128>}, {transform_indices = @transform_1, window_bounds = array<i64: 16, 8, 128>}]} {
    %c0 = arith.constant 0 : index
    %c0_0 = arith.constant 0 : index
    %c0_1 = arith.constant 0 : index
    %0 = vector.load %arg1[%c0, %c0_0, %c0_1] : memref<3x8x128xf32, #tpu.memory_space<vmem>>, vector<1x8x128xf32>
    %1 = vector.shape_cast %0 : vector<1x8x128xf32> to vector<8x128xf32>
    %c1 = arith.constant 1 : index
    %c0_2 = arith.constant 0 : index
    %c0_3 = arith.constant 0 : index
    %2 = vector.load %arg1[%c1, %c0_2, %c0_3] : memref<3x8x128xf32, #tpu.memory_space<vmem>>, vector<1x8x128xf32>
    %3 = vector.shape_cast %2 : vector<1x8x128xf32> to vector<8x128xf32>
    %c2 = arith.constant 2 : index
    %c0_4 = arith.constant 0 : index
    %c0_5 = arith.constant 0 : index
    %4 = vector.load %arg1[%c2, %c0_4, %c0_5] : memref<3x8x128xf32, #tpu.memory_space<vmem>>, vector<1x8x128xf32>
    %5 = vector.shape_cast %4 : vector<1x8x128xf32> to vector<8x128xf32>
    %cst = arith.constant 0.282094806 : f32
    %6 = vector.broadcast %cst : f32 to vector<8x128xf32>
    %c0_6 = arith.constant 0 : index
    %c0_7 = arith.constant 0 : index
    %c0_8 = arith.constant 0 : index
    %7 = vector.load %arg2[%c0_6, %c0_7, %c0_8] : memref<16x8x128xf32, #tpu.memory_space<vmem>>, vector<1x8x128xf32>
    %8 = vector.shape_cast %7 : vector<1x8x128xf32> to vector<8x128xf32>
    %9 = vector.shape_cast %6 : vector<8x128xf32> to vector<1x8x128xf32>
    tpu.vector_store %arg2[%c0_6, %c0_7, %c0_8], %9 {strides = array<i32>} : memref<16x8x128xf32, #tpu.memory_space<vmem>>, vector<1x8x128xf32>,
    %cst_9 = arith.constant -0.488602519 : f32
    %10 = vector.broadcast %cst_9 : f32 to vector<8x128xf32>
    %11 = arith.mulf %10, %3 : vector<8x128xf32>
    %c1_10 = arith.constant 1 : index
    %c0_11 = arith.constant 0 : index
    %c0_12 = arith.constant 0 : index
    %12 = vector.load %arg2[%c1_10, %c0_11, %c0_12] : memref<16x8x128xf32, #tpu.memory_space<vmem>>, vector<1x8x128xf32>
    %13 = vector.shape_cast %12 : vector<1x8x128xf32> to vector<8x128xf32>
    %14 = vector.shape_cast %11 : vector<8x128xf32> to vector<1x8x128xf32>
    tpu.vector_store %arg2[%c1_10, %c0_11, %c0_12], %14 {strides = array<i32>} : memref<16x8x128xf32, #tpu.memory_space<vmem>>, vector<1x8x128xf32>,
    %cst_13 = arith.constant 0.488602519 : f32
    %15 = vector.broadcast %cst_13 : f32 to vector<8x128xf32>
    %16 = arith.mulf %15, %5 : vector<8x128xf32>
    %c2_14 = arith.constant 2 : index
    %c0_15 = arith.constant 0 : index
    %c0_16 = arith.constant 0 : index
    %17 = vector.load %arg2[%c2_14, %c0_15, %c0_16] : memref<16x8x128xf32, #tpu.memory_space<vmem>>, vector<1x8x128xf32>
    %18 = vector.shape_cast %17 : vector<1x8x128xf32> to vector<8x128xf32>
    %19 = vector.shape_cast %16 : vector<8x128xf32> to vector<1x8x128xf32>
    tpu.vector_store %arg2[%c2_14, %c0_15, %c0_16], %19 {strides = array<i32>} : memref<16x8x128xf32, #tpu.memory_space<vmem>>, vector<1x8x128xf32>,
    %cst_17 = arith.constant -0.488602519 : f32
    %20 = vector.broadcast %cst_17 : f32 to vector<8x128xf32>
    %21 = arith.mulf %20, %1 : vector<8x128xf32>
    %c3 = arith.constant 3 : index
    %c0_18 = arith.constant 0 : index
    %c0_19 = arith.constant 0 : index
    %22 = vector.load %arg2[%c3, %c0_18, %c0_19] : memref<16x8x128xf32, #tpu.memory_space<vmem>>, vector<1x8x128xf32>
    %23 = vector.shape_cast %22 : vector<1x8x128xf32> to vector<8x128xf32>
    %24 = vector.shape_cast %21 : vector<8x128xf32> to vector<1x8x128xf32>
    tpu.vector_store %arg2[%c3, %c0_18, %c0_19], %24 {strides = array<i32>} : memref<16x8x128xf32, #tpu.memory_space<vmem>>, vector<1x8x128xf32>,
    %25 = arith.mulf %1, %1 : vector<8x128xf32>
    %26 = arith.mulf %3, %3 : vector<8x128xf32>
    %27 = arith.mulf %5, %5 : vector<8x128xf32>
    %28 = arith.mulf %1, %3 : vector<8x128xf32>
    %29 = arith.mulf %3, %5 : vector<8x128xf32>
    %30 = arith.mulf %1, %5 : vector<8x128xf32>
    %31 = arith.subf %25, %26 : vector<8x128xf32>
    %cst_20 = arith.constant 1.09254849 : f32
    %32 = vector.broadcast %cst_20 : f32 to vector<8x128xf32>
    %33 = arith.mulf %32, %28 : vector<8x128xf32>
    %c4 = arith.constant 4 : index
    %c0_21 = arith.constant 0 : index
    %c0_22 = arith.constant 0 : index
    %34 = vector.load %arg2[%c4, %c0_21, %c0_22] : memref<16x8x128xf32, #tpu.memory_space<vmem>>, vector<1x8x128xf32>
    %35 = vector.shape_cast %34 : vector<1x8x128xf32> to vector<8x128xf32>
    %36 = vector.shape_cast %33 : vector<8x128xf32> to vector<1x8x128xf32>
    tpu.vector_store %arg2[%c4, %c0_21, %c0_22], %36 {strides = array<i32>} : memref<16x8x128xf32, #tpu.memory_space<vmem>>, vector<1x8x128xf32>,
    %cst_23 = arith.constant -1.09254849 : f32
    %37 = vector.broadcast %cst_23 : f32 to vector<8x128xf32>
    %38 = arith.mulf %37, %29 : vector<8x128xf32>
    %c5 = arith.constant 5 : index
    %c0_24 = arith.constant 0 : index
    %c0_25 = arith.constant 0 : index
    %39 = vector.load %arg2[%c5, %c0_24, %c0_25] : memref<16x8x128xf32, #tpu.memory_space<vmem>>, vector<1x8x128xf32>
    %40 = vector.shape_cast %39 : vector<1x8x128xf32> to vector<8x128xf32>
    %41 = vector.shape_cast %38 : vector<8x128xf32> to vector<1x8x128xf32>
    tpu.vector_store %arg2[%c5, %c0_24, %c0_25], %41 {strides = array<i32>} : memref<16x8x128xf32, #tpu.memory_space<vmem>>, vector<1x8x128xf32>,
    %cst_26 = arith.constant 2.000000e+00 : f32
    %42 = vector.broadcast %cst_26 : f32 to vector<8x128xf32>
    %43 = arith.mulf %42, %27 : vector<8x128xf32>
    %44 = arith.subf %43, %25 : vector<8x128xf32>
    %45 = arith.subf %44, %26 : vector<8x128xf32>
    %cst_27 = arith.constant 0.31539157 : f32
    %46 = vector.broadcast %cst_27 : f32 to vector<8x128xf32>
    %47 = arith.mulf %46, %45 : vector<8x128xf32>
    %c6 = arith.constant 6 : index
    %c0_28 = arith.constant 0 : index
    %c0_29 = arith.constant 0 : index
    %48 = vector.load %arg2[%c6, %c0_28, %c0_29] : memref<16x8x128xf32, #tpu.memory_space<vmem>>, vector<1x8x128xf32>
    %49 = vector.shape_cast %48 : vector<1x8x128xf32> to vector<8x128xf32>
    %50 = vector.shape_cast %47 : vector<8x128xf32> to vector<1x8x128xf32>
    tpu.vector_store %arg2[%c6, %c0_28, %c0_29], %50 {strides = array<i32>} : memref<16x8x128xf32, #tpu.memory_space<vmem>>, vector<1x8x128xf32>,
    %cst_30 = arith.constant -1.09254849 : f32
    %51 = vector.broadcast %cst_30 : f32 to vector<8x128xf32>
    %52 = arith.mulf %51, %30 : vector<8x128xf32>
    %c7 = arith.constant 7 : index
    %c0_31 = arith.constant 0 : index
    %c0_32 = arith.constant 0 : index
    %53 = vector.load %arg2[%c7, %c0_31, %c0_32] : memref<16x8x128xf32, #tpu.memory_space<vmem>>, vector<1x8x128xf32>
    %54 = vector.shape_cast %53 : vector<1x8x128xf32> to vector<8x128xf32>
    %55 = vector.shape_cast %52 : vector<8x128xf32> to vector<1x8x128xf32>
    tpu.vector_store %arg2[%c7, %c0_31, %c0_32], %55 {strides = array<i32>} : memref<16x8x128xf32, #tpu.memory_space<vmem>>, vector<1x8x128xf32>,
    %cst_33 = arith.constant 0.546274245 : f32
    %56 = vector.broadcast %cst_33 : f32 to vector<8x128xf32>
    %57 = arith.mulf %56, %31 : vector<8x128xf32>
    %c8 = arith.constant 8 : index
    %c0_34 = arith.constant 0 : index
    %c0_35 = arith.constant 0 : index
    %58 = vector.load %arg2[%c8, %c0_34, %c0_35] : memref<16x8x128xf32, #tpu.memory_space<vmem>>, vector<1x8x128xf32>
    %59 = vector.shape_cast %58 : vector<1x8x128xf32> to vector<8x128xf32>
    %60 = vector.shape_cast %57 : vector<8x128xf32> to vector<1x8x128xf32>
    tpu.vector_store %arg2[%c8, %c0_34, %c0_35], %60 {strides = array<i32>} : memref<16x8x128xf32, #tpu.memory_space<vmem>>, vector<1x8x128xf32>,
    %cst_36 = arith.constant 3.000000e+00 : f32
    %61 = vector.broadcast %cst_36 : f32 to vector<8x128xf32>
    %62 = arith.mulf %61, %25 : vector<8x128xf32>
    %cst_37 = arith.constant 3.000000e+00 : f32
    %63 = vector.broadcast %cst_37 : f32 to vector<8x128xf32>
    %64 = arith.mulf %63, %26 : vector<8x128xf32>
    %65 = arith.subf %62, %26 : vector<8x128xf32>
    %66 = arith.subf %25, %64 : vector<8x128xf32>
    %cst_38 = arith.constant 4.000000e+00 : f32
    %67 = vector.broadcast %cst_38 : f32 to vector<8x128xf32>
    %68 = arith.mulf %67, %27 : vector<8x128xf32>
    %69 = arith.subf %68, %25 : vector<8x128xf32>
    %70 = arith.subf %69, %26 : vector<8x128xf32>
    %cst_39 = arith.constant -0.590043604 : f32
    %71 = vector.broadcast %cst_39 : f32 to vector<8x128xf32>
    %72 = arith.mulf %71, %3 : vector<8x128xf32>
    %73 = arith.mulf %72, %65 : vector<8x128xf32>
    %c9 = arith.constant 9 : index
    %c0_40 = arith.constant 0 : index
    %c0_41 = arith.constant 0 : index
    %74 = vector.load %arg2[%c9, %c0_40, %c0_41] : memref<16x8x128xf32, #tpu.memory_space<vmem>>, vector<1x8x128xf32>
    %75 = vector.shape_cast %74 : vector<1x8x128xf32> to vector<8x128xf32>
    %76 = vector.shape_cast %73 : vector<8x128xf32> to vector<1x8x128xf32>
    tpu.vector_store %arg2[%c9, %c0_40, %c0_41], %76 {strides = array<i32>} : memref<16x8x128xf32, #tpu.memory_space<vmem>>, vector<1x8x128xf32>,
    %cst_42 = arith.constant 2.89061141 : f32
    %77 = vector.broadcast %cst_42 : f32 to vector<8x128xf32>
    %78 = arith.mulf %77, %28 : vector<8x128xf32>
    %79 = arith.mulf %78, %5 : vector<8x128xf32>
    %c10 = arith.constant 10 : index
    %c0_43 = arith.constant 0 : index
    %c0_44 = arith.constant 0 : index
    %80 = vector.load %arg2[%c10, %c0_43, %c0_44] : memref<16x8x128xf32, #tpu.memory_space<vmem>>, vector<1x8x128xf32>
    %81 = vector.shape_cast %80 : vector<1x8x128xf32> to vector<8x128xf32>
    %82 = vector.shape_cast %79 : vector<8x128xf32> to vector<1x8x128xf32>
    tpu.vector_store %arg2[%c10, %c0_43, %c0_44], %82 {strides = array<i32>} : memref<16x8x128xf32, #tpu.memory_space<vmem>>, vector<1x8x128xf32>,
    %cst_45 = arith.constant -0.457045794 : f32
    %83 = vector.broadcast %cst_45 : f32 to vector<8x128xf32>
    %84 = arith.mulf %83, %3 : vector<8x128xf32>
    %85 = arith.mulf %84, %70 : vector<8x128xf32>
    %c11 = arith.constant 11 : index
    %c0_46 = arith.constant 0 : index
    %c0_47 = arith.constant 0 : index
    %86 = vector.load %arg2[%c11, %c0_46, %c0_47] : memref<16x8x128xf32, #tpu.memory_space<vmem>>, vector<1x8x128xf32>
    %87 = vector.shape_cast %86 : vector<1x8x128xf32> to vector<8x128xf32>
    %88 = vector.shape_cast %85 : vector<8x128xf32> to vector<1x8x128xf32>
    tpu.vector_store %arg2[%c11, %c0_46, %c0_47], %88 {strides = array<i32>} : memref<16x8x128xf32, #tpu.memory_space<vmem>>, vector<1x8x128xf32>,
    %cst_48 = arith.constant 0.373176336 : f32
    %89 = vector.broadcast %cst_48 : f32 to vector<8x128xf32>
    %90 = arith.mulf %89, %5 : vector<8x128xf32>
    %cst_49 = arith.constant 2.000000e+00 : f32
    %91 = vector.broadcast %cst_49 : f32 to vector<8x128xf32>
    %92 = arith.mulf %91, %27 : vector<8x128xf32>
    %93 = arith.subf %92, %62 : vector<8x128xf32>
    %94 = arith.subf %93, %64 : vector<8x128xf32>
    %95 = arith.mulf %90, %94 : vector<8x128xf32>
    %c12 = arith.constant 12 : index
    %c0_50 = arith.constant 0 : index
    %c0_51 = arith.constant 0 : index
    %96 = vector.load %arg2[%c12, %c0_50, %c0_51] : memref<16x8x128xf32, #tpu.memory_space<vmem>>, vector<1x8x128xf32>
    %97 = vector.shape_cast %96 : vector<1x8x128xf32> to vector<8x128xf32>
    %98 = vector.shape_cast %95 : vector<8x128xf32> to vector<1x8x128xf32>
    tpu.vector_store %arg2[%c12, %c0_50, %c0_51], %98 {strides = array<i32>} : memref<16x8x128xf32, #tpu.memory_space<vmem>>, vector<1x8x128xf32>,
    %cst_52 = arith.constant -0.457045794 : f32
    %99 = vector.broadcast %cst_52 : f32 to vector<8x128xf32>
    %100 = arith.mulf %99, %1 : vector<8x128xf32>
    %101 = arith.mulf %100, %70 : vector<8x128xf32>
    %c13 = arith.constant 13 : index
    %c0_53 = arith.constant 0 : index
    %c0_54 = arith.constant 0 : index
    %102 = vector.load %arg2[%c13, %c0_53, %c0_54] : memref<16x8x128xf32, #tpu.memory_space<vmem>>, vector<1x8x128xf32>
    %103 = vector.shape_cast %102 : vector<1x8x128xf32> to vector<8x128xf32>
    %104 = vector.shape_cast %101 : vector<8x128xf32> to vector<1x8x128xf32>
    tpu.vector_store %arg2[%c13, %c0_53, %c0_54], %104 {strides = array<i32>} : memref<16x8x128xf32, #tpu.memory_space<vmem>>, vector<1x8x128xf32>,
    %cst_55 = arith.constant 1.44530571 : f32
    %105 = vector.broadcast %cst_55 : f32 to vector<8x128xf32>
    %106 = arith.mulf %105, %5 : vector<8x128xf32>
    %107 = arith.mulf %106, %31 : vector<8x128xf32>
    %c14 = arith.constant 14 : index
    %c0_56 = arith.constant 0 : index
    %c0_57 = arith.constant 0 : index
    %108 = vector.load %arg2[%c14, %c0_56, %c0_57] : memref<16x8x128xf32, #tpu.memory_space<vmem>>, vector<1x8x128xf32>
    %109 = vector.shape_cast %108 : vector<1x8x128xf32> to vector<8x128xf32>
    %110 = vector.shape_cast %107 : vector<8x128xf32> to vector<1x8x128xf32>
    tpu.vector_store %arg2[%c14, %c0_56, %c0_57], %110 {strides = array<i32>} : memref<16x8x128xf32, #tpu.memory_space<vmem>>, vector<1x8x128xf32>,
    %cst_58 = arith.constant -0.590043604 : f32
    %111 = vector.broadcast %cst_58 : f32 to vector<8x128xf32>
    %112 = arith.mulf %111, %1 : vector<8x128xf32>
    %113 = arith.mulf %112, %66 : vector<8x128xf32>
    %c15 = arith.constant 15 : index
    %c0_59 = arith.constant 0 : index
    %c0_60 = arith.constant 0 : index
    %114 = vector.load %arg2[%c15, %c0_59, %c0_60] : memref<16x8x128xf32, #tpu.memory_space<vmem>>, vector<1x8x128xf32>
    %115 = vector.shape_cast %114 : vector<1x8x128xf32> to vector<8x128xf32>
    %116 = vector.shape_cast %113 : vector<8x128xf32> to vector<1x8x128xf32>
    tpu.vector_store %arg2[%c15, %c0_59, %c0_60], %116 {strides = array<i32>} : memref<16x8x128xf32, #tpu.memory_space<vmem>>, vector<1x8x128xf32>,
    return
  }
  func.func @transform_0(%arg0: i32) -> (i32, i32, i32) {
    %c0_i32 = arith.constant 0 : i32
    %c0_i32_0 = arith.constant 0 : i32
    %c0_i32_1 = arith.constant 0 : i32
    return %c0_i32, %arg0, %c0_i32_0 : i32, i32, i32
  }
  func.func @transform_1(%arg0: i32) -> (i32, i32, i32) {
    %c0_i32 = arith.constant 0 : i32
    %c0_i32_0 = arith.constant 0 : i32
    %c0_i32_1 = arith.constant 0 : i32
    return %c0_i32, %arg0, %c0_i32_0 : i32, i32, i32
  }
}

</mosaic_0001>

<bundles_post_ra>
// kernel: spherical_encode.1
= control target key start
LH: loop header
LB: loop body
LE: loop exit
PB: predicated region body
PF: predicated region fallthrough
CT: control target
= control target key end

     0   :  { %v107_v0 = vmov 0.2820948   ;;  %s175_s1 = inlined_call_operand.vmem [shape: f32[16,8,128], index: 1, kind: output, shape index: {}]   ;;  %s176_s0 = inlined_call_operand.vmem [shape: f32[3,8,128], index: 0, kind: input, shape index: {}]  }
   0x1   :  { %13 = vst [vmem:[%s175_s1] sm:$0xff] %v107_v0  ;;  %v89_v1 = vld [vmem:[%s176_s0 + $0x8] sm:$0xff]  ;;  %v90_v2 = vld [vmem:[%s176_s0 + $0x10] sm:$0xff]  ;;  %v8_v3 = vld [vmem:[%s176_s0] sm:$0xff] }
   0x2   :  { %v14_v4 = vmul.f32 -0.48860252, %v89_v1  ;;  %v17_v5 = vmul.f32 0.48860252, %v90_v2  ;;  %v20_v6 = vmul.f32 -0.48860252, %v8_v3  ;;  %v26_v7 = vmul.f32 %v89_v1, %v8_v3 }
   0x3   :  { %v27_v8 = vmul.f32 %v90_v2, %v89_v1  ;;  %v23_v9 = vmul.f32 %v8_v3, %v8_v3  ;;  %v24_v10 = vmul.f32 %v89_v1, %v89_v1  ;;  %v25_v11 = vmul.f32 %v90_v2, %v90_v2 }
   0x4   :  { %91 = vst [vmem:[%s175_s1 + $0x8] sm:$0xff] %v14_v4  ;;  %92 = vst [vmem:[%s175_s1 + $0x10] sm:$0xff] %v17_v5  ;;  %v30_v12 = vmul.f32 1.0925485, %v26_v7  ;;  %v28_v13 = vmul.f32 %v90_v2, %v8_v3  ;;  %v55_v14 = vmul.f32 -0.5900436, %v89_v1 }
   0x5   :  { %93 = vst [vmem:[%s175_s1 + $0x18] sm:$0xff] %v20_v6  ;;  %v59_v15 = vmul.f32 2.8906114, %v26_v7  ;;  %v33_v16 = vmul.f32 -1.0925485, %v27_v8  ;;  %v36_v17 = vmul.f32 2.0, %v25_v11  ;;  %v29_v18 = vsub.f32 %v23_v9, %v24_v10 }
   0x6   :  { %v48_v19 = vmul.f32 3.0, %v23_v9  ;;  %94 = vst [vmem:[%s175_s1 + $0x20] sm:$0xff] %v30_v12  ;;  %v42_v20 = vmul.f32 -1.0925485, %v28_v13  ;;  %v52_v22 = vmul.f32 4.0, %v25_v11  ;;  %v49_v27 = vmul.f32 3.0, %v24_v10 }
   0x7   :  { %v60_v21 = vmul.f32 %v90_v2, %v59_v15  ;;  %v63_v23 = vmul.f32 -0.4570458, %v89_v1  ;;  %95 = vst [vmem:[%s175_s1 + $0x28] sm:$0xff] %v33_v16  ;;  %v37_v24 = vsub.f32 %v36_v17, %v23_v9  ;;  %v45_v25 = vmul.f32 0.54627424, %v29_v18 }
   0x8   :  { %v50_v26 = vsub.f32 %v48_v19, %v24_v10  ;;  %97 = vst [vmem:[%s175_s1 + $0x38] sm:$0xff] %v42_v20  ;;  %v53_v28 = vsub.f32 %v52_v22, %v23_v9  ;;  %v67_v29 = vmul.f32 0.37317634, %v90_v2  ;;  %v68_v30 = vsub.f32 %v36_v17, %v48_v19 }
   0x9   :  { %100 = vst [vmem:[%s175_s1 + $0x50] sm:$0xff] %v60_v21  ;;  %v73_v31 = vmul.f32 -0.4570458, %v8_v3  ;;  %v38_v32 = vsub.f32 %v37_v24, %v24_v10  ;;  %98 = vst [vmem:[%s175_s1 + $0x40] sm:$0xff] %v45_v25  ;;  %v77_v34 = vmul.f32 1.4453057, %v90_v2  ;;  %v51_v35 = vsub.f32 %v23_v9, %v49_v27 }
   0xa   :  { %v56_v33 = vmul.f32 %v55_v14, %v50_v26  ;;  %v54_v36 = vsub.f32 %v53_v28, %v24_v10  ;;  %v69_v37 = vsub.f32 %v68_v30, %v49_v27  ;;  %v81_v38 = vmul.f32 -0.5900436, %v8_v3 }
   0xb   :  { %v39_v39 = vmul.f32 0.31539157, %v38_v32  ;;  %v78_v40 = vmul.f32 %v77_v34, %v29_v18 }
   0xc   :  { %99 = vst [vmem:[%s175_s1 + $0x48] sm:$0xff] %v56_v33  ;;  %v64_v41 = vmul.f32 %v63_v23, %v54_v36  ;;  %v70_v42 = vmul.f32 %v69_v37, %v67_v29  ;;  %v74_v43 = vmul.f32 %v73_v31, %v54_v36  ;;  %v82_v44 = vmul.f32 %v81_v38, %v51_v35 }
   0xd   :  { %96 = vst [vmem:[%s175_s1 + $0x30] sm:$0xff] %v39_v39  ;;  %104 = vst [vmem:[%s175_s1 + $0x70] sm:$0xff] %v78_v40 }
   0xe   :  { %101 = vst [vmem:[%s175_s1 + $0x58] sm:$0xff] %v64_v41  ;;  %102 = vst [vmem:[%s175_s1 + $0x60] sm:$0xff] %v70_v42 }
   0xf   :  { %103 = vst [vmem:[%s175_s1 + $0x68] sm:$0xff] %v74_v43  ;;  %105 = vst [vmem:[%s175_s1 + $0x78] sm:$0xff] %v82_v44 }

</bundles_post_ra>
